<compile_context>
chip_gen: v6e
topology: v6e:2x2x1
jax: 0.10.0
libtpu: 0.0.40
codegen_flags: <defaults>
</compile_context>

<pallas_src>
import jax
import jax.numpy as jnp
from jax.experimental import pallas as pl
from jax.experimental.pallas import tpu as pltpu


_VMEM_LIMIT_BYTES = 48 * 1024 * 1024  # < v7x 64 MiB physical; > v5e 16 MiB default scoped


def _round_up(x: int, m: int) -> int:
    return ((x + m - 1) // m) * m


def _pick_tile(dim: int, cap: int, align: int) -> int:
    """Largest tile (multiple of `align`, <= cap) keeping padded dead work <= ~12.5%."""
    padded_min = _round_up(dim, align)
    if padded_min <= cap:
        return padded_min  # whole (aligned) dim fits in one tile
    best = align
    t = align
    while t <= cap:
        waste = _round_up(dim, t) - dim
        if waste * 8 <= dim:
            best = t
        t += align
    return best


# ----------------------------- kernels ------------------------------------- #

def _linear_kernel_single_k(x_ref, wt_ref, b_ref, o_ref):
    """Whole contraction in one shot: y = b + x @ Wt (f32 accumulate on MXU)."""
    o_ref[...] = (b_ref[...] + jnp.dot(x_ref[...], wt_ref[...],
                                       preferred_element_type=jnp.float32)
                  ).astype(o_ref.dtype)


def _linear_kernel_multi_k(x_ref, wt_ref, b_ref, o_ref, acc_ref):
    """One (tm, tn) output tile; grid axis 2 (k) is the contraction."""
    k = pl.program_id(2)

    @pl.when(k == 0)
    def _():
        # Fold bias into the accumulator init instead of an epilogue add.
        acc_ref[...] = jnp.broadcast_to(b_ref[...], acc_ref.shape)

    acc_ref[...] += jnp.dot(x_ref[...], wt_ref[...],
                            preferred_element_type=jnp.float32)

    @pl.when(k == pl.num_programs(2) - 1)
    def _():
        o_ref[...] = acc_ref[...].astype(o_ref.dtype)


# ----------------------------- wrapper -------------------------------------- #

def make_two_layer_net_forward(weight, bias, *, compute_dtype=jnp.bfloat16):
    """One-time parameter prep (transpose / pad / cast) + jitted forward(x).

    weight: (out_dim, in_dim) f32 (PyTorch nn.Linear layout); bias: (out_dim,) f32.
    Returned forward(x) computes x @ W.T + b with an f32 accumulator.
    """
    out_dim, in_dim = weight.shape
    sublane = 16 if compute_dtype == jnp.bfloat16 else 8

    # K / N tiling is a property of the weights -> choose once, pad once.
    tk = _pick_tile(in_dim, 2048, 128)
    tn = _pick_tile(out_dim, 512, 128)
    K_pad = _round_up(in_dim, tk)
    N_pad = _round_up(out_dim, tn)

    # Hoisted layout plumbing (runs once, not per forward call):
    w_t = jnp.asarray(weight, jnp.float32).T                      # (K, N)
    if (K_pad, N_pad) != (in_dim, out_dim):
        w_t = jnp.pad(w_t, ((0, K_pad - in_dim), (0, N_pad - out_dim)))
    w_t = w_t.astype(compute_dtype)                               # MXU operand dtype
    b_row = jnp.pad(jnp.asarray(bias, jnp.float32),
                    (0, N_pad - out_dim)).reshape(1, N_pad)       # stays f32

    def forward(x):
        B = x.shape[0]
        out_dtype = x.dtype

        tm = _pick_tile(B, 512, sublane)
        M_pad = _round_up(B, tm)

        # v7x has 2 TensorCores: ensure >= 2 parallel output tiles when legal.
        tm_c, tn_c = tm, tn
        if (M_pad // tm_c) * (N_pad // tn_c) == 1:
            if tn_c >= 256:
                tn_c //= 2          # still a multiple of 128
            elif tm_c >= 2 * sublane:
                tm_c //= 2          # still a multiple of the sublane pack

        xp = x.astype(compute_dtype)
        if (M_pad, K_pad) != (B, in_dim):
            xp = jnp.pad(xp, ((0, M_pad - B), (0, K_pad - in_dim)))

        m_tiles = M_pad // tm_c
        n_tiles = N_pad // tn_c
        k_tiles = K_pad // tk

        itemsize = jnp.dtype(compute_dtype).itemsize
        cost = pl.CostEstimate(
            flops=2 * B * in_dim * out_dim,
            bytes_accessed=(M_pad * K_pad * itemsize * n_tiles       # x re-streamed per N tile
                            + K_pad * N_pad * itemsize * m_tiles     # W re-streamed per M tile
                            + N_pad * 4                              # bias
                            + M_pad * N_pad * jnp.dtype(out_dtype).itemsize),
            transcendentals=0,
        )

        if k_tiles == 1:
            # Fast path: whole contraction in one tile -> no scratch, no phases,
            # fully parallel 2-D grid.
            grid_spec = pltpu.PrefetchScalarGridSpec(
                num_scalar_prefetch=0,
                grid=(m_tiles, n_tiles),
                in_specs=[
                    pl.BlockSpec((tm_c, tk), lambda i, j: (i, 0)),   # x tile
                    pl.BlockSpec((tk, tn_c), lambda i, j: (0, j)),   # W.T tile
                    pl.BlockSpec((1, tn_c), lambda i, j: (0, j)),    # bias tile
                ],
                out_specs=pl.BlockSpec((tm_c, tn_c), lambda i, j: (i, j)),
            )
            kernel = _linear_kernel_single_k
            dim_sem = ("parallel", "parallel")
        else:
            grid_spec = pltpu.PrefetchScalarGridSpec(
                num_scalar_prefetch=0,
                grid=(m_tiles, n_tiles, k_tiles),
                in_specs=[
                    pl.BlockSpec((tm_c, tk), lambda i, j, k: (i, k)),   # x tile
                    # On v5e, pipeline_mode=pl.Buffered(3) on this weight spec can help
                    # if profiling shows exposed DMA; keep default 2-deep unless measured.
                    pl.BlockSpec((tk, tn_c), lambda i, j, k: (k, j)),   # W.T tile
                    pl.BlockSpec((1, tn_c), lambda i, j, k: (0, j)),    # bias tile
                ],
                out_specs=pl.BlockSpec((tm_c, tn_c), lambda i, j, k: (i, j)),
                scratch_shapes=[pltpu.VMEM((tm_c, tn_c), jnp.float32)],
            )
            kernel = _linear_kernel_multi_k
            dim_sem = ("parallel", "parallel", "arbitrary")

        out_padded = pl.pallas_call(
            kernel,
            out_shape=jax.ShapeDtypeStruct((M_pad, N_pad), out_dtype),
            grid_spec=grid_spec,
            compiler_params=pltpu.CompilerParams(
                dimension_semantics=dim_sem,
                vmem_limit_bytes=_VMEM_LIMIT_BYTES,
            ),
            cost_estimate=cost,
        )(xp, w_t, b_row)

        if (M_pad, N_pad) != (B, out_dim):
            out_padded = out_padded[:B, :out_dim]
        return out_padded

    return jax.jit(forward)


if __name__ == "__main__":
    # Small shapes consistent with the module: batch=8, in_dim=32, out_dim=16.
    B, IN_DIM, OUT_DIM = 8, 32, 16

    key = jax.random.PRNGKey(0)
    kx, kw, kb = jax.random.split(key, 3)

    # PyTorch-style init: U(-1/sqrt(in_dim), 1/sqrt(in_dim)).
    bound = 1.0 / (IN_DIM ** 0.5)
    x = jax.random.normal(kx, (B, IN_DIM), dtype=jnp.float32)
    weight = jax.random.uniform(kw, (OUT_DIM, IN_DIM), jnp.float32,
                                minval=-bound, maxval=bound)
    bias = jax.random.uniform(kb, (OUT_DIM,), jnp.float32,
                              minval=-bound, maxval=bound)

    fwd = make_two_layer_net_forward(weight, bias, compute_dtype=jnp.bfloat16)
    out = jax.block_until_ready(fwd(x))
    assert out.shape == (B, OUT_DIM)

    # Tight check vs. a reference with the same bf16 operand rounding + f32 accumulate.
    x_bf = x.astype(jnp.bfloat16).astype(jnp.float32)
    w_bf = weight.astype(jnp.bfloat16).astype(jnp.float32)
    ref_bf16 = x_bf @ w_bf.T + bias
    assert jnp.allclose(out, ref_bf16, atol=1e-4, rtol=1e-4)

    # Loose sanity check vs. the exact f32 nn.Linear reference.
    ref_f32 = x @ weight.T + bias
    assert jnp.allclose(out, ref_f32, atol=5e-2, rtol=5e-2)

    print("KERNEL_OK")
</pallas_src>

<mosaic_0001>
module attributes {stable_mosaic.version = 11 : i64} {
  func.func @_linear_kernel_single_k(%arg0: i32, %arg1: i32, %arg2: memref<16x128xbf16, #tpu.memory_space<vmem>>, %arg3: memref<128x128xbf16, #tpu.memory_space<vmem>>, %arg4: memref<1x128xf32, #tpu.memory_space<vmem>>, %arg5: memref<16x128xf32, #tpu.memory_space<vmem>>) attributes {dimension_semantics = [#tpu.dimension_semantics<parallel>, #tpu.dimension_semantics<parallel>], iteration_bounds = array<i64: 1, 1>, scalar_prefetch = 0 : i64, scratch_operands = 0 : i64, tpu.core_type = #tpu.core_type<tc>, window_params = [{transform_indices = @transform_0, window_bounds = array<i64: 16, 128>}, {transform_indices = @transform_1, window_bounds = array<i64: 128, 128>}, {transform_indices = @transform_2, window_bounds = array<i64: 1, 128>}, {transform_indices = @transform_3, window_bounds = array<i64: 16, 128>}]} {
    %c0 = arith.constant 0 : index
    %c0_0 = arith.constant 0 : index
    %0 = vector.load %arg4[%c0, %c0_0] : memref<1x128xf32, #tpu.memory_space<vmem>>, vector<1x128xf32>
    %c0_1 = arith.constant 0 : index
    %c0_2 = arith.constant 0 : index
    %1 = vector.load %arg2[%c0_1, %c0_2] : memref<16x128xbf16, #tpu.memory_space<vmem>>, vector<16x128xbf16>
    %c0_3 = arith.constant 0 : index
    %c0_4 = arith.constant 0 : index
    %2 = vector.load %arg3[%c0_3, %c0_4] : memref<128x128xbf16, #tpu.memory_space<vmem>>, vector<128x128xbf16>
    %cst = arith.constant dense<0.000000e+00> : vector<16x128xf32>
    %3 = tpu.matmul %1, %2, %cst {dimension_numbers = #tpu.dot_dimension_numbers<[1], [0], [0], [1], [0, 0, 1, 1], [], []>} : vector<16x128xbf16>, vector<128x128xbf16>, vector<16x128xf32> -> vector<16x128xf32>
    %4 = vector.broadcast %0 : vector<1x128xf32> to vector<16x128xf32>
    %5 = arith.addf %4, %3 : vector<16x128xf32>
    %c0_5 = arith.constant 0 : index
    %c0_6 = arith.constant 0 : index
    %6 = vector.load %arg5[%c0_5, %c0_6] : memref<16x128xf32, #tpu.memory_space<vmem>>, vector<16x128xf32>
    tpu.vector_store %arg5[%c0_5, %c0_6], %5 {strides = array<i32>} : memref<16x128xf32, #tpu.memory_space<vmem>>, vector<16x128xf32>,
    return
  }
  func.func @transform_0(%arg0: i32, %arg1: i32) -> (i32, i32) {
    %c0_i32 = arith.constant 0 : i32
    %c0_i32_0 = arith.constant 0 : i32
    return %arg0, %c0_i32 : i32, i32
  }
  func.func @transform_1(%arg0: i32, %arg1: i32) -> (i32, i32) {
    %c0_i32 = arith.constant 0 : i32
    %c0_i32_0 = arith.constant 0 : i32
    return %c0_i32, %arg1 : i32, i32
  }
  func.func @transform_2(%arg0: i32, %arg1: i32) -> (i32, i32) {
    %c0_i32 = arith.constant 0 : i32
    %c0_i32_0 = arith.constant 0 : i32
    return %c0_i32, %arg1 : i32, i32
  }
  func.func @transform_3(%arg0: i32, %arg1: i32) -> (i32, i32) {
    %c0_i32 = arith.constant 0 : i32
    return %arg0, %arg1 : i32, i32
  }
}

</mosaic_0001>

<bundles_post_ra>
// kernel: forward.1
= control target key start
LH: loop header
LB: loop body
LE: loop exit
PB: predicated region body
PF: predicated region fallthrough
CT: control target
= control target key end

     0   :  { %8 = vsyncpa [#allocation3], 0  ;;  %s233_s12 = smov [#allocation2]   ;;  %s273_s0 = inlined_call_operand.vmem [shape: bf16[16,128], index: 0, kind: input, shape index: {}]   ;;  %s274_s1 = inlined_call_operand.hbm [shape: bf16[128,128], index: 1, kind: input, shape index: {}]   ;;  %s275_s2 = inlined_call_operand.vmem [shape: f32[1,128], index: 2, kind: input, shape index: {}]   ;;  %s276_s3 = inlined_call_operand.vmem [shape: f32[16,128], index: 3, kind: output, shape index: {}]  }
   0x1   :  { %s16_s13 = sshll.u32 %s233_s12, 4  ;;  %s17_s13 = int_to_ptr.vmem [resolvable:$true] %s16_s13 }
   0x2   :  { %s219_s14 = scalar_lea.vmem %s17_s13, 1024  ;;  %p224_p1 = scmp.lt.s32.totalorder %s17_s13, %s17_s13 }
   0x3   :  { %p220_p0 = scmp.ne.s32.totalorder %s17_s13, %s219_s14  ;;  %p225_p2 = scmp.lt.s32.totalorder %s219_s14, %s219_s14 }
   0x5   :  { %p226_p3 = por %p225_p2, %p224_p1 }
   0x7   :  { %p227_p4 = pnand %p226_p3, %p220_p0 }
   0x9   :  { %230 = shalt.err (!%p227_p4)
}
   0xa   :  { %s234_s15 = smov 64   ;;  %s235_s16 = smov 4  }
   0xb   :  { %22 = dma.hbm_to_vmem [thread:$0]  %s274_s1, 1024, %s17_s13, [#allocation3], %s234_s15, %s234_s15, %s235_s16  }
   0xc   :  { %231 = dma.done.wait [#allocation3], 1024  }
   0xd   :  { %232 = vsyncadd [#allocation3], 4294966272  ;;  %v236_v0 = vmov 0.0   ;;  %vm237_vm0 = vmmov 0   ;;  %v202_v1 = vld [vmem:[#allocation2 + $0x38] sm:$0xff]   ;;  %v203_v2 = vld [vmem:[#allocation2 + $0x30] sm:$0xff]  }
   0xe   :  { %177 = vmatprep.subr.bf16.mxu0 %v236_v0  ;;  %193 = vmatprep.mubr.msk.bf16.mxu0 %vm237_vm0, %v236_v0  ;;  %v204_v3 = vld [vmem:[#allocation2 + $0x28] sm:$0xff]   ;;  %v205_v4 = vld [vmem:[#allocation2 + $0x20] sm:$0xff]   ;;  %v206_v5 = vld [vmem:[#allocation2 + $0x18] sm:$0xff]  }
   0xf   :  { %178 = vmatpush3.bf16.msra.mxu0 %v202_v1  ;;  %v207_v6 = vld [vmem:[#allocation2 + $0x10] sm:$0xff]   ;;  %v208_v7 = vld [vmem:[#allocation2 + $0x8] sm:$0xff]   ;;  %v209_v8 = vld [vmem:[#allocation2] sm:$0xff]  }
  0x10   :  { %179 = vmatprep.subr.bf16.mxu0 %v236_v0  ;;  %v210_v9 = vld [vmem:[%s273_s0] sm:$0xff]  }
  0x11   :  { %v167_v10 = vld [vmem:[%s275_s2] ss:$0 sm:$0xff] }
  0x13   :  { %180 = vmatpush3.bf16.msra.mxu0 %v203_v2 }
  0x14   :  { %181 = vmatprep.subr.bf16.mxu0 %v236_v0 }
  0x17   :  { %182 = vmatpush3.bf16.msra.mxu0 %v204_v3 }
  0x18   :  { %183 = vmatprep.subr.bf16.mxu0 %v236_v0 }
  0x1b   :  { %184 = vmatpush3.bf16.msra.mxu0 %v205_v4 }
  0x1c   :  { %185 = vmatprep.subr.bf16.mxu0 %v236_v0 }
  0x1f   :  { %186 = vmatpush3.bf16.msra.mxu0 %v206_v5 }
  0x20   :  { %187 = vmatprep.subr.bf16.mxu0 %v236_v0 }
  0x23   :  { %188 = vmatpush3.bf16.msra.mxu0 %v207_v6 }
  0x24   :  { %189 = vmatprep.subr.bf16.mxu0 %v236_v0 }
  0x27   :  { %190 = vmatpush3.bf16.msra.mxu0 %v208_v7 }
  0x28   :  { %191 = vmatprep.subr.bf16.mxu0 %v236_v0 }
  0x2b   :  { %192 = vmatpush3.bf16.msra.mxu0 %v209_v8 }
  0x2e   :  { %194 = vmatmul.mubr.bf16.vlgmr.msra.gmra.mxu0 %v210_v9 }
  0xee   :  { %v136_v11 = vpop.f32.mrf.mxu0 }
  0xef   :  { %v149_v12 = vadd.f32 %v167_v10, %v136_v11 }
  0xf0   :  { %v195_v13 = vpop.f32.mrf.mxu0 }
  0xf1   :  { %151 = vst [vmem:[%s276_s3] sm:$0xff] %v149_v12 }
  0xf2   :  { %v139_v14 = vpop.f32.mrf.mxu0 }
  0xf3   :  { %v150_v15 = vadd.f32 %v167_v10, %v139_v14 }
  0xf4   :  { %v196_v16 = vpop.f32.mrf.mxu0 }
  0xf5   :  { %152 = vst [vmem:[%s276_s3 + $0x8] sm:$0xff] %v150_v15 }
  0xf6   :  { %157 = vsyncpa [#allocation3], 1 }

</bundles_post_ra>
